<compile_context>
chip_gen: v7x
topology: tpu7x:2x2x1
jax: 0.10.0
libtpu: 0.0.40
codegen_flags: <defaults>
</compile_context>

<pallas_src>
from functools import partial

import jax
import jax.numpy as jnp
from jax.experimental import pallas as pl
from jax.experimental.pallas import tpu as pltpu


def _dqn_kernel(x_ref, w1_ref, b1_ref, w2_ref, b2_ref, w3_ref, b3_ref, o_ref):
    # x arrives as f32; cast to bf16 in-kernel (VPU pack, not the binding slot).
    x = x_ref[...].astype(jnp.bfloat16)
    # fc1 + relu  (bf16 MXU inputs, f32 accumulate, f32 bias/ReLU)
    h1 = jnp.dot(x, w1_ref[...], preferred_element_type=jnp.float32)
    h1 = jnp.maximum(h1 + b1_ref[...], 0.0)
    # fc2 + relu
    h2 = jnp.dot(h1.astype(jnp.bfloat16), w2_ref[...],
                 preferred_element_type=jnp.float32)
    h2 = jnp.maximum(h2 + b2_ref[...], 0.0)
    # fc3 (no activation); output is written at its true width (no lane pad).
    out = jnp.dot(h2.astype(jnp.bfloat16), w3_ref[...],
                  preferred_element_type=jnp.float32)
    o_ref[...] = (out + b3_ref[...]).astype(o_ref.dtype)


def _pick_tile(B, block_b):
    """Largest multiple-of-8 tile that divides B, capped so the grid has >=2
    steps (v7x megacore); falls back to a single full-batch tile when B is
    small or not a multiple of 8 (block dims then equal the full array dims)."""
    if B < 16 or B % 8 != 0:
        return B
    cap = min(block_b, B // 2)
    cap = max(8, (cap // 8) * 8)
    tm = cap
    while B % tm != 0:
        tm -= 8
    return tm


def _vmem_limit_bytes(tm, in_dim, h1, h2, out_dim):
    bf16, f32 = 2, 4
    need = (
        2 * tm * in_dim * f32                                 # double-buffered x tile (f32)
        + 2 * tm * out_dim * f32                              # double-buffered out tile
        + (in_dim * h1 + h1 * h2 + h2 * out_dim) * bf16       # resident weights
        + (h1 + h2 + out_dim) * f32                           # resident biases
        + tm * in_dim * bf16                                  # in-kernel bf16 copy of x
        + tm * (h1 + h2) * (f32 + bf16)                       # intermediates
    )
    # ~2x headroom over the true footprint; never request more than v7x VMEM.
    return int(min(64 * 1024 * 1024, max(4 * 1024 * 1024, 2 * need)))


@partial(jax.jit, static_argnames=("block_b",))
def dqn_forward(x, params, *, block_b=4096):
    """x: (B, input_dim) float32. params: prepared dict (bf16 weights, f32 biases)."""
    B, in_dim = x.shape
    h1_dim = params["w1"].shape[1]
    h2_dim = params["w2"].shape[1]
    out_dim = params["w3"].shape[1]

    tm = _pick_tile(B, block_b)
    grid = (B // tm,)

    const = lambda a: pl.BlockSpec(a.shape, lambda i: (0,) * a.ndim)

    return pl.pallas_call(
        _dqn_kernel,
        out_shape=jax.ShapeDtypeStruct((B, out_dim), jnp.float32),
        grid_spec=pltpu.PrefetchScalarGridSpec(
            num_scalar_prefetch=0,
            grid=grid,
            in_specs=[
                pl.BlockSpec((tm, in_dim), lambda i: (i, 0)),  # streamed x (f32)
                const(params["w1"]), const(params["b1"]),      # VMEM-resident
                const(params["w2"]), const(params["b2"]),
                const(params["w3"]), const(params["b3"]),
            ],
            out_specs=pl.BlockSpec((tm, out_dim), lambda i: (i, 0)),
        ),
        compiler_params=pltpu.CompilerParams(
            dimension_semantics=("parallel",),   # shard batch tiles on v7x's 2 TCs
            vmem_limit_bytes=_vmem_limit_bytes(tm, in_dim, h1_dim, h2_dim, out_dim),
        ),
    )(x, params["w1"], params["b1"], params["w2"], params["b2"],
      params["w3"], params["b3"])


def prepare_params(params):
    """One-time conversion: weights -> bf16 (MXU inputs), biases stay f32."""
    return {
        "w1": params["w1"].astype(jnp.bfloat16),
        "w2": params["w2"].astype(jnp.bfloat16),
        "w3": params["w3"].astype(jnp.bfloat16),
        "b1": params["b1"],
        "b2": params["b2"],
        "b3": params["b3"],
    }


def init_dqn_params(key, input_dim, output_dim):
    """Deterministic init mirroring nn.Linear default (U[-1/sqrt(fan_in), +])."""
    dims = [(input_dim, 64), (64, 32), (32, output_dim)]
    params = {}
    for i, (fan_in, fan_out) in enumerate(dims, start=1):
        key, kw, kb = jax.random.split(key, 3)
        bound = 1.0 / jnp.sqrt(float(fan_in))
        # stored as (in, out): equivalent to PyTorch weight.T
        params[f"w{i}"] = jax.random.uniform(
            kw, (fan_in, fan_out), jnp.float32, -bound, bound)
        params[f"b{i}"] = jax.random.uniform(
            kb, (1, fan_out), jnp.float32, -bound, bound)
    return params


def dqn_reference_f32(x, params):
    h = jnp.maximum(x @ params["w1"] + params["b1"], 0.0)
    h = jnp.maximum(h @ params["w2"] + params["b2"], 0.0)
    return h @ params["w3"] + params["b3"]


def dqn_reference_bf16(x, params):
    """Reference mirroring the kernel's bf16-matmul / f32-accumulate path."""
    def mm(a, w):
        return jnp.dot(a.astype(jnp.bfloat16), w.astype(jnp.bfloat16),
                       preferred_element_type=jnp.float32)
    h = jnp.maximum(mm(x, params["w1"]) + params["b1"], 0.0)
    h = jnp.maximum(mm(h, params["w2"]) + params["b2"], 0.0)
    return mm(h, params["w3"]) + params["b3"]


if __name__ == "__main__":
    key = jax.random.PRNGKey(0)
    batch, input_dim, output_dim = 8, 16, 4

    key, kx = jax.random.split(key)
    x = jax.random.normal(kx, (batch, input_dim), dtype=jnp.float32)
    params = init_dqn_params(key, input_dim, output_dim)
    params_bf = prepare_params(params)

    out = dqn_forward(x, params_bf)
    jax.block_until_ready(out)
    assert out.shape == (batch, output_dim), out.shape

    ref_match = dqn_reference_bf16(x, params)
    ref_f32 = dqn_reference_f32(x, params)
    assert jnp.allclose(out, ref_match, atol=1e-3, rtol=1e-3), \
        "mismatch vs bf16-matched reference"
    assert jnp.allclose(out, ref_f32, atol=5e-2, rtol=5e-2), \
        "mismatch vs f32 reference"

    # Larger batch: exercises multi-step batch grid (pipelined x stream,
    # VMEM-resident weights, parallel axis split over >=2 tiles, no batch pad).
    key, kx2 = jax.random.split(key)
    x_big = jax.random.normal(kx2, (2048, input_dim), dtype=jnp.float32)
    out_big = dqn_forward(x_big, params_bf, block_b=512)
    jax.block_until_ready(out_big)
    assert out_big.shape == (2048, output_dim), out_big.shape
    assert jnp.allclose(out_big, dqn_reference_bf16(x_big, params),
                        atol=1e-3, rtol=1e-3), "mismatch on large batch"

    # Odd batch (not a multiple of 8): single full-batch tile, still no padding.
    key, kx3 = jax.random.split(key)
    x_odd = jax.random.normal(kx3, (13, input_dim), dtype=jnp.float32)
    out_odd = dqn_forward(x_odd, params_bf)
    jax.block_until_ready(out_odd)
    assert out_odd.shape == (13, output_dim), out_odd.shape
    assert jnp.allclose(out_odd, dqn_reference_bf16(x_odd, params),
                        atol=1e-3, rtol=1e-3), "mismatch on odd batch"

    print("KERNEL_OK")
</pallas_src>

<mosaic_0001>
module attributes {stable_mosaic.version = 11 : i64} {
  func.func @_dqn_kernel(%arg0: i32, %arg1: memref<8x16xf32, #tpu.memory_space<vmem>>, %arg2: memref<16x64xbf16, #tpu.memory_space<vmem>>, %arg3: memref<1x64xf32, #tpu.memory_space<vmem>>, %arg4: memref<64x32xbf16, #tpu.memory_space<vmem>>, %arg5: memref<1x32xf32, #tpu.memory_space<vmem>>, %arg6: memref<32x4xbf16, #tpu.memory_space<vmem>>, %arg7: memref<1x4xf32, #tpu.memory_space<vmem>>, %arg8: memref<8x4xf32, #tpu.memory_space<vmem>>) attributes {dimension_semantics = [#tpu.dimension_semantics<parallel>], iteration_bounds = array<i64: 1>, scalar_prefetch = 0 : i64, scratch_operands = 0 : i64, tpu.core_type = #tpu.core_type<tc>, window_params = [{transform_indices = @transform_0, window_bounds = array<i64: 8, 16>}, {pipeline_mode = #tpu.pipeline_mode<synchronous>, transform_indices = @transform_1, window_bounds = array<i64: 16, 64>}, {pipeline_mode = #tpu.pipeline_mode<synchronous>, transform_indices = @transform_2, window_bounds = array<i64: 1, 64>}, {pipeline_mode = #tpu.pipeline_mode<synchronous>, transform_indices = @transform_3, window_bounds = array<i64: 64, 32>}, {pipeline_mode = #tpu.pipeline_mode<synchronous>, transform_indices = @transform_4, window_bounds = array<i64: 1, 32>}, {pipeline_mode = #tpu.pipeline_mode<synchronous>, transform_indices = @transform_5, window_bounds = array<i64: 32, 4>}, {pipeline_mode = #tpu.pipeline_mode<synchronous>, transform_indices = @transform_6, window_bounds = array<i64: 1, 4>}, {transform_indices = @transform_7, window_bounds = array<i64: 8, 4>}]} {
    %c0 = arith.constant 0 : index
    %c0_0 = arith.constant 0 : index
    %0 = vector.load %arg1[%c0, %c0_0] : memref<8x16xf32, #tpu.memory_space<vmem>>, vector<8x16xf32>
    %1 = arith.truncf %0 : vector<8x16xf32> to vector<8x16xbf16>
    %c0_1 = arith.constant 0 : index
    %c0_2 = arith.constant 0 : index
    %2 = vector.load %arg2[%c0_1, %c0_2] : memref<16x64xbf16, #tpu.memory_space<vmem>>, vector<16x64xbf16>
    %cst = arith.constant dense<0.000000e+00> : vector<8x64xf32>
    %3 = tpu.matmul %1, %2, %cst {dimension_numbers = #tpu.dot_dimension_numbers<[1], [0], [0], [1], [0, 0, 1, 1], [], []>} : vector<8x16xbf16>, vector<16x64xbf16>, vector<8x64xf32> -> vector<8x64xf32>
    %c0_3 = arith.constant 0 : index
    %c0_4 = arith.constant 0 : index
    %4 = vector.load %arg3[%c0_3, %c0_4] : memref<1x64xf32, #tpu.memory_space<vmem>>, vector<1x64xf32>
    %5 = vector.broadcast %4 : vector<1x64xf32> to vector<8x64xf32>
    %6 = arith.addf %3, %5 : vector<8x64xf32>
    %cst_5 = arith.constant 0.000000e+00 : f32
    %7 = vector.broadcast %cst_5 : f32 to vector<8x64xf32>
    %8 = arith.maximumf %6, %7 : vector<8x64xf32>
    %9 = arith.truncf %8 : vector<8x64xf32> to vector<8x64xbf16>
    %c0_6 = arith.constant 0 : index
    %c0_7 = arith.constant 0 : index
    %10 = vector.load %arg4[%c0_6, %c0_7] : memref<64x32xbf16, #tpu.memory_space<vmem>>, vector<64x32xbf16>
    %cst_8 = arith.constant dense<0.000000e+00> : vector<8x32xf32>
    %11 = tpu.matmul %9, %10, %cst_8 {dimension_numbers = #tpu.dot_dimension_numbers<[1], [0], [0], [1], [0, 0, 1, 1], [], []>} : vector<8x64xbf16>, vector<64x32xbf16>, vector<8x32xf32> -> vector<8x32xf32>
    %c0_9 = arith.constant 0 : index
    %c0_10 = arith.constant 0 : index
    %12 = vector.load %arg5[%c0_9, %c0_10] : memref<1x32xf32, #tpu.memory_space<vmem>>, vector<1x32xf32>
    %13 = vector.broadcast %12 : vector<1x32xf32> to vector<8x32xf32>
    %14 = arith.addf %11, %13 : vector<8x32xf32>
    %cst_11 = arith.constant 0.000000e+00 : f32
    %15 = vector.broadcast %cst_11 : f32 to vector<8x32xf32>
    %16 = arith.maximumf %14, %15 : vector<8x32xf32>
    %17 = arith.truncf %16 : vector<8x32xf32> to vector<8x32xbf16>
    %c0_12 = arith.constant 0 : index
    %c0_13 = arith.constant 0 : index
    %18 = vector.load %arg6[%c0_12, %c0_13] : memref<32x4xbf16, #tpu.memory_space<vmem>>, vector<32x4xbf16>
    %cst_14 = arith.constant dense<0.000000e+00> : vector<8x4xf32>
    %19 = tpu.matmul %17, %18, %cst_14 {dimension_numbers = #tpu.dot_dimension_numbers<[1], [0], [0], [1], [0, 0, 1, 1], [], []>} : vector<8x32xbf16>, vector<32x4xbf16>, vector<8x4xf32> -> vector<8x4xf32>
    %c0_15 = arith.constant 0 : index
    %c0_16 = arith.constant 0 : index
    %20 = vector.load %arg7[%c0_15, %c0_16] : memref<1x4xf32, #tpu.memory_space<vmem>>, vector<1x4xf32>
    %21 = vector.broadcast %20 : vector<1x4xf32> to vector<8x4xf32>
    %22 = arith.addf %19, %21 : vector<8x4xf32>
    %c0_17 = arith.constant 0 : index
    %c0_18 = arith.constant 0 : index
    %23 = vector.load %arg8[%c0_17, %c0_18] : memref<8x4xf32, #tpu.memory_space<vmem>>, vector<8x4xf32>
    tpu.vector_store %arg8[%c0_17, %c0_18], %22 {strides = array<i32>} : memref<8x4xf32, #tpu.memory_space<vmem>>, vector<8x4xf32>,
    return
  }
  func.func @transform_0(%arg0: i32) -> (i32, i32) {
    %c0_i32 = arith.constant 0 : i32
    %c0_i32_0 = arith.constant 0 : i32
    return %arg0, %c0_i32 : i32, i32
  }
  func.func @transform_1(%arg0: i32) -> (i32, i32) {
    %c0_i32 = arith.constant 0 : i32
    %c0_i32_0 = arith.constant 0 : i32
    %c0_i32_1 = arith.constant 0 : i32
    return %c0_i32, %c0_i32_0 : i32, i32
  }
  func.func @transform_2(%arg0: i32) -> (i32, i32) {
    %c0_i32 = arith.constant 0 : i32
    %c0_i32_0 = arith.constant 0 : i32
    %c0_i32_1 = arith.constant 0 : i32
    return %c0_i32, %c0_i32_0 : i32, i32
  }
  func.func @transform_3(%arg0: i32) -> (i32, i32) {
    %c0_i32 = arith.constant 0 : i32
    %c0_i32_0 = arith.constant 0 : i32
    %c0_i32_1 = arith.constant 0 : i32
    return %c0_i32, %c0_i32_0 : i32, i32
  }
  func.func @transform_4(%arg0: i32) -> (i32, i32) {
    %c0_i32 = arith.constant 0 : i32
    %c0_i32_0 = arith.constant 0 : i32
    %c0_i32_1 = arith.constant 0 : i32
    return %c0_i32, %c0_i32_0 : i32, i32
  }
  func.func @transform_5(%arg0: i32) -> (i32, i32) {
    %c0_i32 = arith.constant 0 : i32
    %c0_i32_0 = arith.constant 0 : i32
    %c0_i32_1 = arith.constant 0 : i32
    return %c0_i32, %c0_i32_0 : i32, i32
  }
  func.func @transform_6(%arg0: i32) -> (i32, i32) {
    %c0_i32 = arith.constant 0 : i32
    %c0_i32_0 = arith.constant 0 : i32
    %c0_i32_1 = arith.constant 0 : i32
    return %c0_i32, %c0_i32_0 : i32, i32
  }
  func.func @transform_7(%arg0: i32) -> (i32, i32) {
    %c0_i32 = arith.constant 0 : i32
    %c0_i32_0 = arith.constant 0 : i32
    return %arg0, %c0_i32 : i32, i32
  }
}

</mosaic_0001>

<bundles_post_ra>
// kernel: dqn_forward.1
= control target key start
LH: loop header
LB: loop body
LE: loop exit
PB: predicated region body
PF: predicated region fallthrough
CT: control target
= control target key end

     0   :  { %v306_v0 = vmov 0.0   ;;  %vm307_vm0 = vmmov 0   ;;  %vm44_vm1 = vcmask 130048   ;;  %vm129_vm2 = vcmask 523264   ;;  %s384_s1 = inlined_call_operand.vmem [shape: bf16[16,64], index: 1, kind: input, shape index: {}]   ;;  %s385_s0 = inlined_call_operand.vmem [shape: f32[8,16], index: 0, kind: input, shape index: {}]   ;;  %s386_s3 = inlined_call_operand.vmem [shape: bf16[64,32], index: 3, kind: input, shape index: {}]   ;;  %s387_s5 = inlined_call_operand.vmem [shape: bf16[32,4], index: 5, kind: input, shape index: {}]   ;;  %s388_s2 = inlined_call_operand.vmem [shape: f32[1,64], index: 2, kind: input, shape index: {}]   ;;  %s389_s4 = inlined_call_operand.vmem [shape: f32[1,32], index: 4, kind: input, shape index: {}]   ;;  %s390_s6 = inlined_call_operand.vmem [shape: f32[1,4], index: 6, kind: input, shape index: {}]   ;;  %s391_s7 = inlined_call_operand.vmem [shape: f32[8,4], index: 7, kind: output, shape index: {}]  }
   0x1   :  { %271 = vmatprep.subr.bf16.mxu0 %v306_v0  ;;  %v299_v1 = vld [vmem:[%s384_s1] sm:$0xff]   ;;  %273 = vmatprep.mubr.msk.bf16.mxu0 %vm307_vm0, %v306_v0  ;;  %v301_v5 = vld [vmem:[%s386_s3 + $0x8] sm:$0xff]   ;;  %v302_v6 = vld [vmem:[%s386_s3 + $0x10] sm:$0xff]   ;;  %vm198_vm3 = vcmask 261120   ;;  %vm242_vm4 = vcmask 31744  }
   0x2   :  { %v27_v2 = vld [vmem:[%s385_s0] sm:$0xff]  ;;  %277 = vmatprep.subr.bf16.mxu1 %v306_v0  ;;  %285 = vmatprep.mubr.msk.bf16.mxu1 %vm307_vm0, %v306_v0  ;;  %v303_v7 = vld [vmem:[%s386_s3 + $0x18] sm:$0xff]   ;;  %v305_v17 = vld [vmem:[%s387_s5 + $0x8] sm:$0xff]  }
   0x3   :  { %272 = vmatpush3.bf16.msra.mxu0 %v299_v1  ;;  %v28_v3 = vpack.c.bf16 %v27_v2, %v27_v2  ;;  %v300_v4 = vld [vmem:[%s386_s3] sm:$0xff]  }
   0x4   :  { %289 = vmatprep.subr.bf16.mxu0 %v306_v0  ;;  %278 = vmatpush3.bf16.msra.mxu1 %v300_v4  ;;  %v304_v8 = vld [vmem:[%s387_s5] sm:$0xff]  }
   0x5   :  { %279 = vmatprep.subr.bf16.mxu1 %v306_v0  ;;  %v248_v9 = vld [vmem:[%s388_s2] ss:$0 sm:$0xff] }
   0x6   :  { %274 = vmatmul.mubr.msk.bf16.vlgmr.msra.gmra.mrb[0].mxu0 %vm44_vm1, %v28_v3  ;;  %v251_v18 = vld [vmem:[%s389_s4] ss:$0 sm:$0xff] }
   0x7   :  { %293 = vmatprep.mubr.msk.bf16.mxu0 %vm307_vm0, %v306_v0  ;;  %290 = vmatpush3.bf16.msra.mxu0 %v304_v8  ;;  %v257_v26 = vld [vmem:[%s390_s6] ss:$0 sm:$0xff] }
   0x8   :  { %280 = vmatpush3.bf16.msra.mxu1 %v301_v5  ;;  %291 = vmatprep.subr.bf16.mxu0 %v306_v0 }
   0x9   :  { %281 = vmatprep.subr.bf16.mxu1 %v306_v0 }
   0xb   :  { %292 = vmatpush3.bf16.msra.mxu0 %v305_v17 }
   0xc   :  { %282 = vmatpush3.bf16.msra.mxu1 %v302_v6 }
   0xd   :  { %283 = vmatprep.subr.bf16.mxu1 %v306_v0 }
  0x10   :  { %284 = vmatpush3.bf16.msra.mxu1 %v303_v7 }
  0xd9   :  { %v82_v10 = vpop.f32.mrb[0].mxu0 }
  0xda   :  { %v83_v11 = vadd.f32 %v248_v9, %v82_v10  ;;  %v275_v12 = vpop.f32.mrb[1].mxu0 }
  0xdb   :  { %v85_v13 = vpop.f32.mrb[2].mxu0 }
  0xdc   :  { %v88_v14 = vmax.f32 %v83_v11, 0.0  ;;  %v276_v15 = vpop.f32.mrb[3].mxu0 }
  0xde   :  { %v89_v16 = vpack.c.bf16 %v88_v14, %v88_v14 }
  0xe0   :  { %286 = vmatmul.mubr.msk.bf16.vlgmr.msra.gmra.mrb[0].mxu1 %vm129_vm2, %v89_v16 }
 0x1b3   :  { %v167_v19 = vpop.f32.mrb[0].mxu1 }
 0x1b4   :  { %v168_v20 = vadd.f32 %v251_v18, %v167_v19  ;;  %v287_v21 = vpop.f32.mrb[1].mxu1 }
 0x1b5   :  { %v170_v22 = vpop.f32.mrb[2].mxu1 }
 0x1b6   :  { %v173_v23 = vmax.f32 %v168_v20, 0.0  ;;  %v288_v24 = vpop.f32.mrb[3].mxu1 }
 0x1b8   :  { %v174_v25 = vpack.c.bf16 %v173_v23, %v173_v23 }
 0x1ba   :  { %294 = vmatmul.mubr.msk.bf16.vlgmr.msra.gmra.mrb[4].mxu0 %vm198_vm3, %v174_v25 }
 0x28d   :  { %v236_v27 = vpop.f32.mrb[4].mxu0 }
 0x28e   :  { %v237_v28 = vadd.f32 %v257_v26, %v236_v27  ;;  %v295_v29 = vpop.f32.mrb[5].mxu0 }
 0x28f   :  { %v239_v30 = vpop.f32.mrb[6].mxu0 }
 0x290   :  { %243 = vst.msk [vmem:[%s391_s7] sm:$0xff] %vm242_vm4, %v237_v28  ;;  %v296_v31 = vpop.f32.mrb[7].mxu0 }

</bundles_post_ra>
